<compile_context>
chip_gen: v6e
topology: v6e:2x2x1
jax: 0.10.0
libtpu: 0.0.40
codegen_flags: <defaults>
</compile_context>

<pallas_src>
import jax
import jax.numpy as jnp
from jax.experimental import pallas as pl
from jax.experimental.pallas import tpu as pltpu


# ---- packed small-parameter layout (all offsets 128-lane aligned) -----------
_B0_OFF, _B0_LEN = 0, 512
_B1_OFF, _B1_LEN = 512, 256
_B2_OFF, _B2_LEN = 768, 128
_B3_OFF, _B3_LEN = 896, 64
_W4_OFF, _W4_LEN = 1024, 64
_B4_OFF, _B4_LEN = 1152, 1
_PACKED_WIDTH = 1280


def _round_up(x, m):
    return ((x + m - 1) // m) * m


def mlp_kernel(x_ref, w0_ref, w1_ref, w2_ref, w3_ref, packed_ref, out_ref):
    """Fused 5-layer MLP (ReLU between layers, last layer linear).

    Consumes a (tm, SL+3) activation tile and writes a lane-dense (1, tm)
    output row per grid step.
    """
    x = x_ref[...].astype(jnp.bfloat16)              # (tm, SL+AL)

    b0 = packed_ref[:, _B0_OFF:_B0_OFF + _B0_LEN]
    b1 = packed_ref[:, _B1_OFF:_B1_OFF + _B1_LEN]
    b2 = packed_ref[:, _B2_OFF:_B2_OFF + _B2_LEN]
    b3 = packed_ref[:, _B3_OFF:_B3_OFF + _B3_LEN]
    w4 = packed_ref[:, _W4_OFF:_W4_OFF + _W4_LEN]    # (1, 64) f32 row
    b4 = packed_ref[:, _B4_OFF:_B4_OFF + _B4_LEN]    # (1, 1)

    # Layer 0: single K=SL+3 matmul (state/action already concatenated).
    h = jnp.dot(x, w0_ref[...], preferred_element_type=jnp.float32) + b0
    h = jnp.maximum(h, 0.0)

    h = jnp.dot(h.astype(jnp.bfloat16), w1_ref[...],
                preferred_element_type=jnp.float32) + b1
    h = jnp.maximum(h, 0.0)

    h = jnp.dot(h.astype(jnp.bfloat16), w2_ref[...],
                preferred_element_type=jnp.float32) + b2
    h = jnp.maximum(h, 0.0)

    h = jnp.dot(h.astype(jnp.bfloat16), w3_ref[...],
                preferred_element_type=jnp.float32) + b3
    h = jnp.maximum(h, 0.0)                          # (tm, 64)

    # Layer 4 (64 -> 1): contract the lane axis of h against the w4 row so the
    # result is produced directly as a lane-dense (1, tm) row.
    out_row = jax.lax.dot_general(
        w4.astype(jnp.bfloat16), h.astype(jnp.bfloat16),
        dimension_numbers=(((1,), (1,)), ((), ())),
        preferred_element_type=jnp.float32)          # (1, tm)
    out_ref[...] = (out_row + b4).astype(out_ref.dtype)


def prepare_params(params):
    """One-time parameter prep, hoisted out of the per-call forward path:
    bf16 casts of the four big weight matrices plus packing of all small f32
    params (biases, w4 row, b4) into one lane-aligned [1, 1280] operand."""
    (w0, b0), (w1, b1), (w2, b2), (w3, b3), (w4, b4) = params
    w0b = jnp.asarray(w0, jnp.bfloat16)   # (SL+3, 512)
    w1b = jnp.asarray(w1, jnp.bfloat16)   # (512, 256)
    w2b = jnp.asarray(w2, jnp.bfloat16)   # (256, 128)
    w3b = jnp.asarray(w3, jnp.bfloat16)   # (128, 64)

    packed = jnp.zeros((1, _PACKED_WIDTH), jnp.float32)
    packed = packed.at[:, _B0_OFF:_B0_OFF + _B0_LEN].set(b0.reshape(1, -1))
    packed = packed.at[:, _B1_OFF:_B1_OFF + _B1_LEN].set(b1.reshape(1, -1))
    packed = packed.at[:, _B2_OFF:_B2_OFF + _B2_LEN].set(b2.reshape(1, -1))
    packed = packed.at[:, _B3_OFF:_B3_OFF + _B3_LEN].set(b3.reshape(1, -1))
    packed = packed.at[:, _W4_OFF:_W4_OFF + _W4_LEN].set(w4.reshape(1, -1))
    packed = packed.at[:, _B4_OFF:_B4_OFF + _B4_LEN].set(b4.reshape(1, -1))
    return (w0b, w1b, w2b, w3b, packed)


def quality_base_model_forward(state, action, prepared, *, tm=1024):
    """state: [B, state_length], action: [B, 3] -> [B, 1] float32.

    tm: rows per grid step (clamped to the 8-aligned batch when B is small).
    1024 amortizes the ~0.35 us/step grid overhead; sweep 512-2048 for peak.
    Per-step VMEM (input tile x2 buffers + activation scratch + <0.5 MB of
    weights) stays far under the 32 MiB scoped default on v5e/v6e/v7x, so no
    vmem_limit_bytes override is needed up to tm~4096.
    """
    assert state.ndim == 2, "QualityBaseModel forward must receive batch"
    assert action.ndim == 2, "QualityBaseModel forward must receive batch"
    assert action.shape[1] == 3, "Invalid action length"

    w0b, w1b, w2b, w3b, packed = prepared
    B, SL = state.shape
    AL = action.shape[1]
    K = SL + AL
    assert w0b.shape[0] == K, "Invalid state length"

    # Single concatenated input -> one K=SL+3 layer-0 matmul inside the kernel.
    x = jnp.concatenate([state.astype(jnp.float32),
                         action.astype(jnp.float32)], axis=1)

    tm_eff = min(tm, _round_up(B, 8))
    padded_b = _round_up(B, tm_eff)
    if padded_b != B:
        x = jnp.pad(x, ((0, padded_b - B), (0, 0)))
    num_blocks = padded_b // tm_eff

    const = lambda i: (0, 0)  # weights: same block every step -> VMEM-resident
    # TODO(synk): on v7x, if xprof shows one TensorCore idle, switch the batch
    # axis to pltpu.CORE_PARALLEL; "parallel" is a harmless no-op on v5e/v6e.
    out = pl.pallas_call(
        mlp_kernel,
        out_shape=jax.ShapeDtypeStruct((num_blocks, tm_eff), jnp.float32),
        grid=(num_blocks,),
        in_specs=[
            pl.BlockSpec((tm_eff, K), lambda i: (i, 0)),   # activation tile
            pl.BlockSpec(w0b.shape, const),
            pl.BlockSpec(w1b.shape, const),
            pl.BlockSpec(w2b.shape, const),
            pl.BlockSpec(w3b.shape, const),
            pl.BlockSpec(packed.shape, const),
        ],
        out_specs=pl.BlockSpec((1, tm_eff), lambda i: (i, 0)),  # lane-dense row
        compiler_params=pltpu.CompilerParams(
            dimension_semantics=("parallel",)),
    )(x, w0b, w1b, w2b, w3b, packed)

    # Lane-dense [num_blocks, tm] back to [B, 1] (row-major flatten preserves
    # batch order), drop padded rows.
    return out.reshape(-1, 1)[:B]


def init_params(key, num_turns):
    """Deterministic init matching the torch layer shapes (Linear: in->out)."""
    state_length = num_turns * 4 + 3
    action_length = 3
    dims = [state_length + action_length, 512, 256, 128, 64, 1]
    params = []
    for i in range(len(dims) - 1):
        key, kw, kb = jax.random.split(key, 3)
        fan_in = dims[i]
        bound = 1.0 / (fan_in ** 0.5)  # same scale torch.nn.Linear uses
        w = jax.random.uniform(kw, (dims[i], dims[i + 1]), jnp.float32,
                               minval=-bound, maxval=bound)
        b = jax.random.uniform(kb, (1, dims[i + 1]), jnp.float32,
                               minval=-bound, maxval=bound)
        params.append((w, b))
    return params


def reference_forward(state, action, params):
    """Plain-JAX reference emulating the kernel's bf16-weight / f32-acc math."""
    x = jnp.concatenate([state, action], axis=1).astype(jnp.float32)
    (w0, b0), (w1, b1), (w2, b2), (w3, b3), (w4, b4) = params
    h = x
    for w, b in ((w0, b0), (w1, b1), (w2, b2), (w3, b3)):
        h = jnp.dot(h.astype(jnp.bfloat16), w.astype(jnp.bfloat16),
                    preferred_element_type=jnp.float32) + b
        h = jnp.maximum(h, 0.0)
    return jnp.dot(h.astype(jnp.bfloat16), w4.astype(jnp.bfloat16),
                   preferred_element_type=jnp.float32) + b4


if __name__ == "__main__":
    num_turns = 8                       # -> state_length = 35, input dim = 38
    batch = 8

    key = jax.random.PRNGKey(0)
    k_state, k_action, k_params = jax.random.split(key, 3)

    state_length = num_turns * 4 + 3
    state = jax.random.normal(k_state, (batch, state_length), jnp.float32)
    action = jax.random.normal(k_action, (batch, 3), jnp.float32)

    params = init_params(k_params, num_turns)
    prepared = prepare_params(params)   # hoisted out of the per-call path

    fwd = jax.jit(quality_base_model_forward)
    out = fwd(state, action, prepared)
    out = jax.block_until_ready(out)

    ref = reference_forward(state, action, params)
    assert out.shape == (batch, 1)
    assert jnp.allclose(out, ref, atol=2e-3, rtol=2e-3), "mismatch vs reference"

    print("KERNEL_OK")
</pallas_src>

<mosaic_0001>
module attributes {stable_mosaic.version = 11 : i64} {
  func.func @mlp_kernel(%arg0: i32, %arg1: memref<8x38xf32, #tpu.memory_space<vmem>>, %arg2: memref<38x512xbf16, #tpu.memory_space<vmem>>, %arg3: memref<512x256xbf16, #tpu.memory_space<vmem>>, %arg4: memref<256x128xbf16, #tpu.memory_space<vmem>>, %arg5: memref<128x64xbf16, #tpu.memory_space<vmem>>, %arg6: memref<1x1280xf32, #tpu.memory_space<vmem>>, %arg7: memref<1x8xf32, #tpu.memory_space<vmem>>) attributes {dimension_semantics = [#tpu.dimension_semantics<parallel>], iteration_bounds = array<i64: 1>, scalar_prefetch = 0 : i64, scratch_operands = 0 : i64, tpu.core_type = #tpu.core_type<tc>, window_params = [{transform_indices = @transform_0, window_bounds = array<i64: 8, 38>}, {pipeline_mode = #tpu.pipeline_mode<synchronous>, transform_indices = @transform_1, window_bounds = array<i64: 38, 512>}, {pipeline_mode = #tpu.pipeline_mode<synchronous>, transform_indices = @transform_2, window_bounds = array<i64: 512, 256>}, {pipeline_mode = #tpu.pipeline_mode<synchronous>, transform_indices = @transform_3, window_bounds = array<i64: 256, 128>}, {pipeline_mode = #tpu.pipeline_mode<synchronous>, transform_indices = @transform_4, window_bounds = array<i64: 128, 64>}, {pipeline_mode = #tpu.pipeline_mode<synchronous>, transform_indices = @transform_5, window_bounds = array<i64: 1, 1280>}, {transform_indices = @transform_6, window_bounds = array<i64: 1, 8>}]} {
    %c0 = arith.constant 0 : index
    %c0_0 = arith.constant 0 : index
    %0 = vector.load %arg1[%c0, %c0_0] : memref<8x38xf32, #tpu.memory_space<vmem>>, vector<8x38xf32>
    %1 = arith.truncf %0 : vector<8x38xf32> to vector<8x38xbf16>
    %c0_1 = arith.constant 0 : index
    %c0_2 = arith.constant 0 : index
    %2 = vector.load %arg6[%c0_1, %c0_2] : memref<1x1280xf32, #tpu.memory_space<vmem>>, vector<1x512xf32>
    %c0_3 = arith.constant 0 : index
    %c512 = arith.constant 512 : index
    %3 = vector.load %arg6[%c0_3, %c512] : memref<1x1280xf32, #tpu.memory_space<vmem>>, vector<1x256xf32>
    %c0_4 = arith.constant 0 : index
    %c768 = arith.constant 768 : index
    %4 = vector.load %arg6[%c0_4, %c768] : memref<1x1280xf32, #tpu.memory_space<vmem>>, vector<1x128xf32>
    %c0_5 = arith.constant 0 : index
    %c896 = arith.constant 896 : index
    %5 = vector.load %arg6[%c0_5, %c896] : memref<1x1280xf32, #tpu.memory_space<vmem>>, vector<1x64xf32>
    %c0_6 = arith.constant 0 : index
    %c1024 = arith.constant 1024 : index
    %6 = vector.load %arg6[%c0_6, %c1024] : memref<1x1280xf32, #tpu.memory_space<vmem>>, vector<1x64xf32>
    %c0_7 = arith.constant 0 : index
    %c1152 = arith.constant 1152 : index
    %7 = vector.load %arg6[%c0_7, %c1152] : memref<1x1280xf32, #tpu.memory_space<vmem>>, vector<1x1xf32>
    %c0_8 = arith.constant 0 : index
    %c0_9 = arith.constant 0 : index
    %8 = vector.load %arg2[%c0_8, %c0_9] : memref<38x512xbf16, #tpu.memory_space<vmem>>, vector<38x512xbf16>
    %cst = arith.constant dense<0.000000e+00> : vector<8x512xf32>
    %9 = tpu.matmul %1, %8, %cst {dimension_numbers = #tpu.dot_dimension_numbers<[1], [0], [0], [1], [0, 0, 1, 1], [], []>} : vector<8x38xbf16>, vector<38x512xbf16>, vector<8x512xf32> -> vector<8x512xf32>
    %10 = vector.broadcast %2 : vector<1x512xf32> to vector<8x512xf32>
    %11 = arith.addf %9, %10 : vector<8x512xf32>
    %cst_10 = arith.constant 0.000000e+00 : f32
    %12 = vector.broadcast %cst_10 : f32 to vector<8x512xf32>
    %13 = arith.maximumf %11, %12 : vector<8x512xf32>
    %14 = arith.truncf %13 : vector<8x512xf32> to vector<8x512xbf16>
    %c0_11 = arith.constant 0 : index
    %c0_12 = arith.constant 0 : index
    %15 = vector.load %arg3[%c0_11, %c0_12] : memref<512x256xbf16, #tpu.memory_space<vmem>>, vector<512x256xbf16>
    %cst_13 = arith.constant dense<0.000000e+00> : vector<8x256xf32>
    %16 = tpu.matmul %14, %15, %cst_13 {dimension_numbers = #tpu.dot_dimension_numbers<[1], [0], [0], [1], [0, 0, 1, 1], [], []>} : vector<8x512xbf16>, vector<512x256xbf16>, vector<8x256xf32> -> vector<8x256xf32>
    %17 = vector.broadcast %3 : vector<1x256xf32> to vector<8x256xf32>
    %18 = arith.addf %16, %17 : vector<8x256xf32>
    %cst_14 = arith.constant 0.000000e+00 : f32
    %19 = vector.broadcast %cst_14 : f32 to vector<8x256xf32>
    %20 = arith.maximumf %18, %19 : vector<8x256xf32>
    %21 = arith.truncf %20 : vector<8x256xf32> to vector<8x256xbf16>
    %c0_15 = arith.constant 0 : index
    %c0_16 = arith.constant 0 : index
    %22 = vector.load %arg4[%c0_15, %c0_16] : memref<256x128xbf16, #tpu.memory_space<vmem>>, vector<256x128xbf16>
    %cst_17 = arith.constant dense<0.000000e+00> : vector<8x128xf32>
    %23 = tpu.matmul %21, %22, %cst_17 {dimension_numbers = #tpu.dot_dimension_numbers<[1], [0], [0], [1], [0, 0, 1, 1], [], []>} : vector<8x256xbf16>, vector<256x128xbf16>, vector<8x128xf32> -> vector<8x128xf32>
    %24 = vector.broadcast %4 : vector<1x128xf32> to vector<8x128xf32>
    %25 = arith.addf %23, %24 : vector<8x128xf32>
    %cst_18 = arith.constant 0.000000e+00 : f32
    %26 = vector.broadcast %cst_18 : f32 to vector<8x128xf32>
    %27 = arith.maximumf %25, %26 : vector<8x128xf32>
    %28 = arith.truncf %27 : vector<8x128xf32> to vector<8x128xbf16>
    %c0_19 = arith.constant 0 : index
    %c0_20 = arith.constant 0 : index
    %29 = vector.load %arg5[%c0_19, %c0_20] : memref<128x64xbf16, #tpu.memory_space<vmem>>, vector<128x64xbf16>
    %cst_21 = arith.constant dense<0.000000e+00> : vector<8x64xf32>
    %30 = tpu.matmul %28, %29, %cst_21 {dimension_numbers = #tpu.dot_dimension_numbers<[1], [0], [0], [1], [0, 0, 1, 1], [], []>} : vector<8x128xbf16>, vector<128x64xbf16>, vector<8x64xf32> -> vector<8x64xf32>
    %31 = vector.broadcast %5 : vector<1x64xf32> to vector<8x64xf32>
    %32 = arith.addf %30, %31 : vector<8x64xf32>
    %cst_22 = arith.constant 0.000000e+00 : f32
    %33 = vector.broadcast %cst_22 : f32 to vector<8x64xf32>
    %34 = arith.maximumf %32, %33 : vector<8x64xf32>
    %35 = arith.truncf %6 : vector<1x64xf32> to vector<1x64xbf16>
    %36 = arith.truncf %34 : vector<8x64xf32> to vector<8x64xbf16>
    %cst_23 = arith.constant dense<0.000000e+00> : vector<1x8xf32>
    %37 = tpu.matmul %35, %36, %cst_23 {dimension_numbers = #tpu.dot_dimension_numbers<[1], [1], [0], [0], [0, 0, 1, 0], [], []>} : vector<1x64xbf16>, vector<8x64xbf16>, vector<1x8xf32> -> vector<1x8xf32>
    %38 = vector.broadcast %7 : vector<1x1xf32> to vector<1x8xf32>
    %39 = arith.addf %37, %38 : vector<1x8xf32>
    %c0_24 = arith.constant 0 : index
    %c0_25 = arith.constant 0 : index
    %40 = vector.load %arg7[%c0_24, %c0_25] : memref<1x8xf32, #tpu.memory_space<vmem>>, vector<1x8xf32>
    tpu.vector_store %arg7[%c0_24, %c0_25], %39 {strides = array<i32>} : memref<1x8xf32, #tpu.memory_space<vmem>>, vector<1x8xf32>,
    return
  }
  func.func @transform_0(%arg0: i32) -> (i32, i32) {
    %c0_i32 = arith.constant 0 : i32
    %c0_i32_0 = arith.constant 0 : i32
    return %arg0, %c0_i32 : i32, i32
  }
  func.func @transform_1(%arg0: i32) -> (i32, i32) {
    %c0_i32 = arith.constant 0 : i32
    %c0_i32_0 = arith.constant 0 : i32
    %c0_i32_1 = arith.constant 0 : i32
    return %c0_i32, %c0_i32_0 : i32, i32
  }
  func.func @transform_2(%arg0: i32) -> (i32, i32) {
    %c0_i32 = arith.constant 0 : i32
    %c0_i32_0 = arith.constant 0 : i32
    %c0_i32_1 = arith.constant 0 : i32
    return %c0_i32, %c0_i32_0 : i32, i32
  }
  func.func @transform_3(%arg0: i32) -> (i32, i32) {
    %c0_i32 = arith.constant 0 : i32
    %c0_i32_0 = arith.constant 0 : i32
    %c0_i32_1 = arith.constant 0 : i32
    return %c0_i32, %c0_i32_0 : i32, i32
  }
  func.func @transform_4(%arg0: i32) -> (i32, i32) {
    %c0_i32 = arith.constant 0 : i32
    %c0_i32_0 = arith.constant 0 : i32
    %c0_i32_1 = arith.constant 0 : i32
    return %c0_i32, %c0_i32_0 : i32, i32
  }
  func.func @transform_5(%arg0: i32) -> (i32, i32) {
    %c0_i32 = arith.constant 0 : i32
    %c0_i32_0 = arith.constant 0 : i32
    %c0_i32_1 = arith.constant 0 : i32
    return %c0_i32, %c0_i32_0 : i32, i32
  }
  func.func @transform_6(%arg0: i32) -> (i32, i32) {
    %c0_i32 = arith.constant 0 : i32
    %c0_i32_0 = arith.constant 0 : i32
    return %arg0, %c0_i32 : i32, i32
  }
}

</mosaic_0001>

<bundles_post_ra>
// kernel: quality_base_model_forward.1
= control target key start
LH: loop header
LB: loop body
LE: loop exit
PB: predicated region body
PF: predicated region fallthrough
CT: control target
= control target key end

     0   :  { %11 = vsyncpa [#allocation3], 0  ;;  %s1634_s0 = inlined_call_operand.vmem [shape: f32[8,38], index: 0, kind: input, shape index: {}]   ;;  %s1635_s1 = inlined_call_operand.hbm [shape: bf16[38,512], index: 1, kind: input, shape index: {}]   ;;  %s1636_s2 = inlined_call_operand.hbm [shape: bf16[512,256], index: 2, kind: input, shape index: {}]   ;;  %s1637_s3 = inlined_call_operand.vmem [shape: bf16[256,128], index: 3, kind: input, shape index: {}]   ;;  %s1638_s4 = inlined_call_operand.vmem [shape: bf16[128,64], index: 4, kind: input, shape index: {}]   ;;  %s1639_s5 = inlined_call_operand.vmem [shape: f32[1,1280], index: 5, kind: input, shape index: {}]   ;;  %s1640_s6 = inlined_call_operand.hbm [shape: f32[1,8], index: 6, kind: output, shape index: {}]  }
   0x1   :  { %12 = vsyncpa [#allocation6], 0 }
   0x2   :  { %13 = vsyncpa [#allocation4], 0  ;;  %s1472_s21 = smov [#allocation2]  }
   0x3   :  { %s21_s22 = sshll.u32 %s1472_s21, 4  ;;  %s22_s22 = int_to_ptr.vmem [resolvable:$true] %s21_s22 }
   0x4   :  { %s1414_s23 = scalar_lea.vmem %s22_s22, 1280  ;;  %p1419_p1 = scmp.lt.s32.totalorder %s22_s22, %s22_s22 }
   0x5   :  { %p1415_p0 = scmp.ne.s32.totalorder %s22_s22, %s1414_s23  ;;  %p1420_p2 = scmp.lt.s32.totalorder %s1414_s23, %s1414_s23 }
   0x7   :  { %p1421_p3 = por %p1420_p2, %p1419_p1 }
   0x9   :  { %p1422_p4 = pnand %p1421_p3, %p1415_p0 }
   0xb   :  { %1425 = shalt.err (!%p1422_p4)
}
   0xc   :  { %s1473_s24 = smov 256   ;;  %s1474_s25 = smov 16  }
   0xd   :  { %27 = dma.hbm_to_vmem [thread:$0]  %s1635_s1, 1280, %s22_s22, [#allocation3], %s1473_s24, %s1473_s24, %s1474_s25  }
   0xe   :  { %s1475_s28 = smov [#allocation5]  }
   0xf   :  { %s33_s29 = sshll.u32 %s1475_s28, 4  ;;  %s34_s29 = int_to_ptr.vmem [resolvable:$true] %s33_s29 }
  0x10   :  { %s1434_s30 = scalar_lea.vmem %s34_s29, 8192  ;;  %p1439_p6 = scmp.lt.s32.totalorder %s34_s29, %s34_s29 }
  0x11   :  { %p1435_p5 = scmp.ne.s32.totalorder %s34_s29, %s1434_s30  ;;  %p1440_p7 = scmp.lt.s32.totalorder %s1434_s30, %s1434_s30 }
  0x13   :  { %p1441_p8 = por %p1440_p7, %p1439_p6 }
  0x15   :  { %p1442_p9 = pnand %p1441_p8, %p1435_p5 }
  0x17   :  { %1445 = shalt.err (!%p1442_p9)
}
  0x18   :  { %s1476_s7 = smov 128   ;;  %s1477_s8 = smov 8  }
  0x19   :  { %39 = dma.hbm_to_vmem [thread:$0]  %s1636_s2, 8192, %s34_s29, [#allocation6], %s1476_s7, %s1476_s7, %s1477_s8  }
  0x1a   :  { %1466 = dma.done.wait [#allocation3], 1280  }
  0x1b   :  { %1467 = vsyncadd [#allocation3], 4294966016 }
  0x1c   :  { %1468 = dma.done.wait [#allocation6], 8192  }
  0x1d   :  { %1469 = vsyncadd [#allocation6], 4294959104  ;;  %v1478_v0 = vmov 0   ;;  %v69_v1 = vld [vmem:[#allocation2 + $0x40] sm:$0x77]  ;;  %vm146_vm0 = vcmask 1042432  }
  0x1e   :  { %191 = vmatprep.mubr.bf16.mxu0 %v1478_v0  ;;  %232 = vmatprep.mubr.bf16.mxu1 %v1478_v0  ;;  %v70_v2 = vld [vmem:[#allocation2 + $0x48] sm:$0x77]  ;;  %v1102_v3 = vcombine.high %v69_v1, %v69_v1  ;;  %v1101_v5 = vcombine.low %v69_v1, %v69_v1  ;;  %v1274_v7 = vld [vmem:[#allocation2 + $0x24] ss:$16 sps:$4 sm:$0xff]   ;;  %v1278_v11 = vld [vmem:[#allocation2 + $0x20] ss:$16 sps:$4 sm:$0xff]  }
  0x1f   :  { %1269 = vset.pattern.permute.xlu0 %v1478_v0  ;;  %v1104_v4 = vcombine.high %v70_v2, %v70_v2  ;;  %v1103_v6 = vcombine.low %v70_v2, %v70_v2  ;;  %v1276_v8 = vld [vmem:[#allocation2 + $0x2c] ss:$16 sps:$4 sm:$0xff]   ;;  %v1279_v12 = vld [vmem:[#allocation2 + $0x28] ss:$16 sps:$4 sm:$0xff]   ;;  %v1280_v13 = vld [vmem:[#allocation2 + $0x4] ss:$16 sps:$4 sm:$0xff]  }
  0x20   :  { %1105 = vmatprep.subr.msk.bf16.mxu0 %vm146_vm0, %v1102_v3  ;;  %v148_v9 = vsel %vm146_vm0, %v1101_v5, 0  ;;  %v1282_v14 = vld [vmem:[#allocation2 + $0xc] ss:$16 sps:$4 sm:$0xff]   ;;  %v1284_v15 = vld [vmem:[#allocation2] ss:$16 sps:$4 sm:$0xff]   ;;  %vm142_vm1 = vcmask 310272  }
  0x21   :  { %1107 = vmatprep.subr.msk.bf16.mxu1 %vm146_vm0, %v1104_v4  ;;  %v154_v10 = vsel %vm146_vm0, %v1103_v6, 0  ;;  %170 = vmatpush1.bf16.msra.mxu0 %v148_v9  ;;  %v1285_v16 = vld [vmem:[#allocation2 + $0x8] ss:$16 sps:$4 sm:$0xff]   ;;  %v53_v17 = vld [vmem:[%s1634_s0] sm:$0xff]  ;;  %v1294_v23 = vld [vmem:[#allocation5 + $0x64] ss:$8 sps:$4 sm:$0xff]  }
  0x22   :  { %211 = vmatpush1.bf16.msra.mxu1 %v154_v10  ;;  %171 = vmatprep.subr.bf16.mxu0 %v1274_v7  ;;  %v1288_v18 = vld [vmem:[#allocation5 + $0x74] ss:$8 sps:$4 sm:$0xff]   ;;  %v54_v20 = vpack.c.bf16 %v53_v17, %v53_v17  ;;  %v1286_v21 = vld [vmem:[#allocation5 + $0x70] ss:$8 sps:$4 sm:$0xff]   ;;  %v1297_v24 = vld [vmem:[#allocation5 + $0x164] ss:$8 sps:$4 sm:$0xff]  }
  0x23   :  { %212 = vmatprep.subr.bf16.mxu1 %v1276_v8  ;;  %v1291_v19 = vld [vmem:[#allocation5 + $0x174] ss:$8 sps:$4 sm:$0xff]   ;;  %v1289_v22 = vld [vmem:[#allocation5 + $0x170] ss:$8 sps:$4 sm:$0xff]   ;;  %v1292_v25 = vld [vmem:[#allocation5 + $0x60] ss:$8 sps:$4 sm:$0xff]  }
  0x24   :  { %v1295_v26 = vld [vmem:[#allocation5 + $0x160] ss:$8 sps:$4 sm:$0xff]   ;;  %v1300_v27 = vld [vmem:[#allocation5 + $0x54] ss:$8 sps:$4 sm:$0xff]   ;;  %v1298_v29 = vld [vmem:[#allocation5 + $0x50] ss:$8 sps:$4 sm:$0xff]  }
  0x25   :  { %172 = vmatpush1.bf16.msra.mxu0 %v1278_v11  ;;  %v1303_v28 = vld [vmem:[#allocation5 + $0x154] ss:$8 sps:$4 sm:$0xff]   ;;  %v1301_v30 = vld [vmem:[#allocation5 + $0x150] ss:$8 sps:$4 sm:$0xff]   ;;  %v1306_v31 = vld [vmem:[#allocation5 + $0x44] ss:$8 sps:$4 sm:$0xff]  }
  0x26   :  { %213 = vmatpush1.bf16.msra.mxu1 %v1279_v12  ;;  %173 = vmatprep.subr.bf16.mxu0 %v1280_v13  ;;  %v1309_v32 = vld [vmem:[#allocation5 + $0x144] ss:$8 sps:$4 sm:$0xff]   ;;  %v1304_v33 = vld [vmem:[#allocation5 + $0x40] ss:$8 sps:$4 sm:$0xff]   ;;  %v1312_v35 = vld [vmem:[#allocation5 + $0x34] ss:$8 sps:$4 sm:$0xff]  }
  0x27   :  { %214 = vmatprep.subr.bf16.mxu1 %v1282_v14  ;;  %v1307_v34 = vld [vmem:[#allocation5 + $0x140] ss:$8 sps:$4 sm:$0xff]   ;;  %v1315_v36 = vld [vmem:[#allocation5 + $0x134] ss:$8 sps:$4 sm:$0xff]   ;;  %v1310_v37 = vld [vmem:[#allocation5 + $0x30] ss:$8 sps:$4 sm:$0xff]  }
  0x28   :  { %v1313_v38 = vld [vmem:[#allocation5 + $0x130] ss:$8 sps:$4 sm:$0xff]   ;;  %v1318_v39 = vld [vmem:[#allocation5 + $0x24] ss:$8 sps:$4 sm:$0xff]   ;;  %v1316_v41 = vld [vmem:[#allocation5 + $0x20] ss:$8 sps:$4 sm:$0xff]  }
  0x29   :  { %174 = vmatpush1.bf16.msra.mxu0 %v1284_v15  ;;  %v1321_v40 = vld [vmem:[#allocation5 + $0x124] ss:$8 sps:$4 sm:$0xff]   ;;  %v1319_v42 = vld [vmem:[#allocation5 + $0x120] ss:$8 sps:$4 sm:$0xff]   ;;  %v1324_v43 = vld [vmem:[#allocation5 + $0x14] ss:$8 sps:$4 sm:$0xff]  }
  0x2a   :  { %215 = vmatpush1.bf16.msra.mxu1 %v1285_v16  ;;  %644 = vmatprep.subr.bf16.mxu0 %v1288_v18  ;;  %v1327_v44 = vld [vmem:[#allocation5 + $0x114] ss:$8 sps:$4 sm:$0xff]   ;;  %v1322_v45 = vld [vmem:[#allocation5 + $0x10] ss:$8 sps:$4 sm:$0xff]   ;;  %v1330_v47 = vld [vmem:[#allocation5 + $0x4] ss:$8 sps:$4 sm:$0xff]  }
  0x2b   :  { %685 = vmatprep.subr.bf16.mxu1 %v1291_v19  ;;  %v1325_v46 = vld [vmem:[#allocation5 + $0x110] ss:$8 sps:$4 sm:$0xff]   ;;  %v1333_v48 = vld [vmem:[#allocation5 + $0x104] ss:$8 sps:$4 sm:$0xff]   ;;  %v1328_v49 = vld [vmem:[#allocation5] ss:$8 sps:$4 sm:$0xff]  }
  0x2c   :  { %1106 = vmatmul.mubr.msk.bf16.vlgmr.msra.gmra.mxu0 %vm142_vm1, %v54_v20  ;;  %v1331_v50 = vld [vmem:[#allocation5 + $0x100] ss:$8 sps:$4 sm:$0xff]   ;;  %v1336_v51 = vld [vmem:[#allocation5 + $0xf4] ss:$8 sps:$4 sm:$0xff]   ;;  %v1334_v53 = vld [vmem:[#allocation5 + $0xf0] ss:$8 sps:$4 sm:$0xff]  }
  0x2d   :  { %1108 = vmatmul.mubr.msk.bf16.vlgmr.msra.gmra.mxu1 %vm142_vm1, %v54_v20  ;;  %645 = vmatpush1.bf16.msra.mxu0 %v1286_v21  ;;  %v1339_v52 = vld [vmem:[#allocation5 + $0x1f4] ss:$8 sps:$4 sm:$0xff]   ;;  %v1337_v54 = vld [vmem:[#allocation5 + $0x1f0] ss:$8 sps:$4 sm:$0xff]   ;;  %v1342_v55 = vld [vmem:[#allocation5 + $0xe4] ss:$8 sps:$4 sm:$0xff]   ;;  %v72_v20 = vlaneseq }
  0x2e   :  { %686 = vmatpush1.bf16.msra.mxu1 %v1289_v22  ;;  %646 = vmatprep.subr.bf16.mxu0 %v1294_v23  ;;  %v1345_v56 = vld [vmem:[#allocation5 + $0x1e4] ss:$8 sps:$4 sm:$0xff]   ;;  %v1340_v57 = vld [vmem:[#allocation5 + $0xe0] ss:$8 sps:$4 sm:$0xff]   ;;  %v1348_v59 = vld [vmem:[#allocation5 + $0xd4] ss:$8 sps:$4 sm:$0xff]  }
  0x2f   :  { %687 = vmatprep.subr.bf16.mxu1 %v1297_v24  ;;  %v1343_v58 = vld [vmem:[#allocation5 + $0x1e0] ss:$8 sps:$4 sm:$0xff]   ;;  %v1351_v60 = vld [vmem:[#allocation5 + $0x1d4] ss:$8 sps:$4 sm:$0xff]   ;;  %v1346_v61 = vld [vmem:[#allocation5 + $0xd0] ss:$8 sps:$4 sm:$0xff]  }
  0x30   :  { %v1349_v62 = vld [vmem:[#allocation5 + $0x1d0] ss:$8 sps:$4 sm:$0xff]   ;;  %v1354_v63 = vld [vmem:[#allocation5 + $0xc4] ss:$8 sps:$4 sm:$0xff]   ;;  %v1352_v1 = vld [vmem:[#allocation5 + $0xc0] ss:$8 sps:$4 sm:$0xff]  }
  0x31   :  { %647 = vmatpush1.bf16.msra.mxu0 %v1292_v25  ;;  %v1357_v0 = vld [vmem:[#allocation5 + $0x1c4] ss:$8 sps:$4 sm:$0xff]   ;;  %v1355_v2 = vld [vmem:[#allocation5 + $0x1c0] ss:$8 sps:$4 sm:$0xff]   ;;  %v1360_v3 = vld [vmem:[#allocation5 + $0xb4] ss:$8 sps:$4 sm:$0xff]  }
  0x32   :  { %688 = vmatpush1.bf16.msra.mxu1 %v1295_v26  ;;  %648 = vmatprep.subr.bf16.mxu0 %v1300_v27  ;;  %v1363_v4 = vld [vmem:[#allocation5 + $0x1b4] ss:$8 sps:$4 sm:$0xff]   ;;  %v1358_v5 = vld [vmem:[#allocation5 + $0xb0] ss:$8 sps:$4 sm:$0xff]   ;;  %v1366_v7 = vld [vmem:[#allocation5 + $0xa4] ss:$8 sps:$4 sm:$0xff]  }
  0x33   :  { %689 = vmatprep.subr.bf16.mxu1 %v1303_v28  ;;  %v1361_v6 = vld [vmem:[#allocation5 + $0x1b0] ss:$8 sps:$4 sm:$0xff]   ;;  %v1369_v8 = vld [vmem:[#allocation5 + $0x1a4] ss:$8 sps:$4 sm:$0xff]   ;;  %v1364_v9 = vld [vmem:[#allocation5 + $0xa0] ss:$8 sps:$4 sm:$0xff]  }
  0x34   :  { %v1367_v10 = vld [vmem:[#allocation5 + $0x1a0] ss:$8 sps:$4 sm:$0xff]   ;;  %v1372_v11 = vld [vmem:[#allocation5 + $0x94] ss:$8 sps:$4 sm:$0xff]   ;;  %v1370_v13 = vld [vmem:[#allocation5 + $0x90] ss:$8 sps:$4 sm:$0xff]  }
  0x35   :  { %649 = vmatpush1.bf16.msra.mxu0 %v1298_v29  ;;  %v1375_v12 = vld [vmem:[#allocation5 + $0x194] ss:$8 sps:$4 sm:$0xff]   ;;  %v1373_v14 = vld [vmem:[#allocation5 + $0x190] ss:$8 sps:$4 sm:$0xff]   ;;  %v1378_v15 = vld [vmem:[#allocation5 + $0x84] ss:$8 sps:$4 sm:$0xff]  }
  0x36   :  { %690 = vmatpush1.bf16.msra.mxu1 %v1301_v30  ;;  %650 = vmatprep.subr.bf16.mxu0 %v1306_v31  ;;  %v1381_v16 = vld [vmem:[#allocation5 + $0x184] ss:$8 sps:$4 sm:$0xff]   ;;  %v1376_v17 = vld [vmem:[#allocation5 + $0x80] ss:$8 sps:$4 sm:$0xff]   ;;  %v1529_v21 = vshrl.u32 %v72_v20, 7  ;;  %vm1480_vm2 = vmmov 0  }
  0x37   :  { %691 = vmatprep.subr.bf16.mxu1 %v1309_v32  ;;  %v1379_v18 = vld [vmem:[#allocation5 + $0x180] ss:$8 sps:$4 sm:$0xff]   ;;  %v55_v24 = vld [vmem:[%s1639_s5] sm:$0xf]  ;;  %vm1028_vm3 = vcmask 523264   ;;  %s1481_s14 = smov [#allocation7]  }
  0x38   :  { %v1382_v19 = vld [vmem:[%s1637_s3 + $0x78] sm:$0xff]   ;;  %v1532_v22 = vsub.s32 0, %v1529_v21  ;;  %v82_v23 = vsub.s32 2, %v1529_v21  ;;  %v78_v25 = vsub.s32 1, %v1529_v21  ;;  %v86_v26 = vsub.s32 3, %v1529_v21  ;;  %v1403_v21 = vld [vmem:[%s1638_s4 + $0x10] sm:$0xff]  }
  0x39   :  { %651 = vmatpush1.bf16.msra.mxu0 %v1304_v33  ;;  %s1083_s15 = sshll.u32 %s1481_s14, 4  ;;  %vm1075_vm4 = vcmask 57344   ;;  %s1084_s15 = int_to_ptr.vmem [resolvable:$true] %s1083_s15 }
  0x3a   :  { %692 = vmatpush1.bf16.msra.mxu1 %v1307_v34  ;;  %652 = vmatprep.subr.bf16.mxu0 %v1312_v35  ;;  %v75_v27 = vrot.slane %v55_v24, %v1532_v22  ;;  %v83_v28 = vrot.slane %v55_v24, %v82_v23  ;;  %v79_v29 = vrot.slane %v55_v24, %v78_v25  ;;  %s1446_s16 = scalar_lea.vmem %s1084_s15, 16  ;;  %s1450_s17 = scalar_lea.vmem %s1084_s15, 32 }
  0x3b   :  { %693 = vmatprep.subr.bf16.mxu1 %v1315_v36  ;;  %v87_v30 = vrot.slane %v55_v24, %v86_v26  ;;  %p1447_p10 = scmp.ne.s32.totalorder %s1084_s15, %s1446_s16  ;;  %p1451_p11 = scmp.lt.s32.totalorder %s1084_s15, %s1084_s15 }
  0x3c   :  { %p1452_p12 = scmp.lt.s32.totalorder %s1450_s17, %s1446_s16 }
  0x3d   :  { %653 = vmatpush1.bf16.msra.mxu0 %v1310_v37 }
  0x3e   :  { %694 = vmatpush1.bf16.msra.mxu1 %v1313_v38  ;;  %654 = vmatprep.subr.bf16.mxu0 %v1318_v39  ;;  %p1453_p13 = por %p1452_p12, %p1451_p11 }
  0x3f   :  { %695 = vmatprep.subr.bf16.mxu1 %v1321_v40 }
  0x40   :  { %p1454_p0 = pnand %p1453_p13, %p1447_p10 }
  0x41   :  { %655 = vmatpush1.bf16.msra.mxu0 %v1316_v41 }
  0x42   :  { %696 = vmatpush1.bf16.msra.mxu1 %v1319_v42  ;;  %656 = vmatprep.subr.bf16.mxu0 %v1324_v43 }
  0x43   :  { %697 = vmatprep.subr.bf16.mxu1 %v1327_v44 }
  0x45   :  { %657 = vmatpush1.bf16.msra.mxu0 %v1322_v45 }
  0x46   :  { %698 = vmatpush1.bf16.msra.mxu1 %v1325_v46  ;;  %658 = vmatprep.subr.bf16.mxu0 %v1330_v47 }
  0x47   :  { %699 = vmatprep.subr.bf16.mxu1 %v1333_v48 }
  0x49   :  { %659 = vmatpush1.bf16.msra.mxu0 %v1328_v49 }
  0x4a   :  { %700 = vmatpush1.bf16.msra.mxu1 %v1331_v50  ;;  %660 = vmatprep.subr.bf16.mxu0 %v1336_v51  ;;  %v1383_v50 = vld [vmem:[%s1637_s3 + $0x38] sm:$0xff]  }
  0x4b   :  { %701 = vmatprep.subr.bf16.mxu1 %v1339_v52  ;;  %v1384_v52 = vld [vmem:[%s1637_s3 + $0x70] sm:$0xff]  }
  0x4d   :  { %661 = vmatpush2.bf16.msra.mxu0 %v1334_v53  ;;  %v1385_v53 = vld [vmem:[%s1637_s3 + $0x30] sm:$0xff]  }
  0x4e   :  { %702 = vmatpush2.bf16.msra.mxu1 %v1337_v54  ;;  %662 = vmatprep.subr.bf16.mxu0 %v1342_v55  ;;  %v1386_v54 = vld [vmem:[%s1637_s3 + $0x68] sm:$0xff]  }
  0x4f   :  { %703 = vmatprep.subr.bf16.mxu1 %v1345_v56  ;;  %v1387_v55 = vld [vmem:[%s1637_s3 + $0x28] sm:$0xff]   ;;  %v1388_v56 = vld [vmem:[%s1637_s3 + $0x60] sm:$0xff]  }
  0x51   :  { %663 = vmatpush2.bf16.msra.mxu0 %v1340_v57  ;;  %v1389_v57 = vld [vmem:[%s1637_s3 + $0x20] sm:$0xff]  }
  0x52   :  { %704 = vmatpush2.bf16.msra.mxu1 %v1343_v58  ;;  %664 = vmatprep.subr.bf16.mxu0 %v1348_v59  ;;  %v1390_v58 = vld [vmem:[%s1637_s3 + $0x58] sm:$0xff]  }
  0x53   :  { %705 = vmatprep.subr.bf16.mxu1 %v1351_v60  ;;  %v1391_v59 = vld [vmem:[%s1637_s3 + $0x18] sm:$0xff]   ;;  %v1392_v60 = vld [vmem:[%s1637_s3 + $0x50] sm:$0xff]  }
  0x55   :  { %665 = vmatpush2.bf16.msra.mxu0 %v1346_v61  ;;  %v1393_v61 = vld [vmem:[%s1637_s3 + $0x10] sm:$0xff]  }
  0x56   :  { %706 = vmatpush2.bf16.msra.mxu1 %v1349_v62  ;;  %666 = vmatprep.subr.bf16.mxu0 %v1354_v63  ;;  %v1394_v62 = vld [vmem:[%s1637_s3 + $0x48] sm:$0xff]  }
  0x57   :  { %707 = vmatprep.subr.bf16.mxu1 %v1357_v0  ;;  %v1395_v63 = vld [vmem:[%s1637_s3 + $0x8] sm:$0xff]   ;;  %v1396_v0 = vld [vmem:[%s1637_s3 + $0x40] sm:$0xff]  }
  0x59   :  { %667 = vmatpush2.bf16.msra.mxu0 %v1352_v1  ;;  %v1397_v1 = vld [vmem:[%s1637_s3] sm:$0xff]  }
  0x5a   :  { %708 = vmatpush2.bf16.msra.mxu1 %v1355_v2  ;;  %668 = vmatprep.subr.bf16.mxu0 %v1360_v3  ;;  %v1398_v2 = vld [vmem:[%s1638_s4 + $0x38] sm:$0xff]   ;;  %v1479_v3 = vmov 0.0  }
  0x5b   :  { %709 = vmatprep.subr.bf16.mxu1 %v1363_v4  ;;  %v1399_v4 = vld [vmem:[%s1638_s4 + $0x30] sm:$0xff]  }
  0x5d   :  { %669 = vmatpush2.bf16.msra.mxu0 %v1358_v5  ;;  %v1400_v5 = vld [vmem:[%s1638_s4 + $0x28] sm:$0xff]  }
  0x5e   :  { %710 = vmatpush2.bf16.msra.mxu1 %v1361_v6  ;;  %670 = vmatprep.subr.bf16.mxu0 %v1366_v7  ;;  %v1401_v6 = vld [vmem:[%s1638_s4 + $0x20] sm:$0xff]   ;;  %v1402_v7 = vld [vmem:[%s1638_s4 + $0x18] sm:$0xff]  }
  0x5f   :  { %711 = vmatprep.subr.bf16.mxu1 %v1369_v8  ;;  %v56_v8 = vld [vmem:[%s1639_s5 + $0x4] sm:$0x3] }
  0x61   :  { %671 = vmatpush2.bf16.msra.mxu0 %v1364_v9  ;;  %v317_v9 = vrot.slane %v56_v8, %v1532_v22 }
  0x62   :  { %712 = vmatpush2.bf16.msra.mxu1 %v1367_v10  ;;  %672 = vmatprep.subr.bf16.mxu0 %v1372_v11  ;;  %v321_v10 = vrot.slane %v56_v8, %v78_v25  ;;  %v1404_v25 = vld [vmem:[%s1638_s4 + $0x8] sm:$0xff]  }
  0x63   :  { %713 = vmatprep.subr.bf16.mxu1 %v1375_v12 }
  0x65   :  { %673 = vmatpush2.bf16.msra.mxu0 %v1370_v13 }
  0x66   :  { %714 = vmatpush2.bf16.msra.mxu1 %v1373_v14  ;;  %674 = vmatprep.subr.bf16.mxu0 %v1378_v15 }
  0x67   :  { %715 = vmatprep.subr.bf16.mxu1 %v1381_v16 }
  0x69   :  { %675 = vmatpush2.bf16.msra.mxu0 %v1376_v17 }
  0x6a   :  { %716 = vmatpush2.bf16.msra.mxu1 %v1379_v18  ;;  %1200 = vmatprep.subr.bf16.mxu0 %v1382_v19 }
  0x6b   :  { %1233 = vmatprep.subr.bf16.mxu1 %v1479_v3 }
  0xec   :  { %v193_v31 = vpop.f32.mrf.mxu0 }
  0xed   :  { %v234_v32 = vpop.f32.mrf.mxu1  ;;  %v194_v33 = vadd.f32 %v193_v31, %v75_v27 }
  0xee   :  { %v235_v34 = vadd.f32 %v234_v32, %v83_v28  ;;  %v195_v35 = vpop.f32.mrf.mxu0  ;;  %v1173_v32 = vld [vmem:[%s1639_s5 + $0x6] ss:$0 sm:$0xff] }
  0xef   :  { %v236_v36 = vpop.f32.mrf.mxu1  ;;  %v196_v38 = vadd.f32 %v195_v35, %v79_v29  ;;  %v241_v40 = vmax.f32 %v194_v33, 0.0 }
  0xf0   :  { %v243_v37 = vmax.f32 %v235_v34, 0.0  ;;  %v237_v39 = vadd.f32 %v236_v36, %v87_v30  ;;  %v197_v41 = vpop.f32.mrf.mxu0  ;;  %v1405_v30 = vld [vmem:[%s1638_s4] sm:$0xff]  }
  0xf1   :  { %v238_v42 = vpop.f32.mrf.mxu1  ;;  %v242_v43 = vmax.f32 %v196_v38, 0.0  ;;  %v245_v51 = vpack.c.bf16 %v241_v40, %v241_v40  ;;  %v60_v40 = vld [vmem:[%s1639_s5 + $0x9] sm:$0x1]  ;;  %v1190_v41 = vld [vmem:[%s1639_s5 + $0x7] ss:$0 sm:$0xff] }
  0xf2   :  { %v244_v44 = vmax.f32 %v237_v39, 0.0  ;;  %v247_v45 = vpack.c.bf16 %v243_v37, %v243_v37  ;;  %v198_v46 = vpop.f32.mrf.mxu0  ;;  %1021 = vperm.xlu0 %1269, %v60_v40  }
  0xf3   :  { %v239_v47 = vpop.f32.mrf.mxu1  ;;  %v246_v48 = vpack.c.bf16 %v242_v43, %v242_v43 }
  0xf4   :  { %v248_v49 = vpack.c.bf16 %v244_v44, %v244_v44 }
  0xf5   :  { %676 = vmatprep.mubr.bf16.mxu0 %v246_v48 }
  0xf6   :  { %717 = vmatprep.mubr.bf16.mxu1 %v248_v49  ;;  %677 = vmatmul.mubr.bf16.vlgmr.msra.gmra.mxu0 %v245_v51 }
  0xf7   :  { %718 = vmatmul.mubr.bf16.vlgmr.msra.gmra.mxu1 %v247_v45  ;;  %1201 = vmatpush3.bf16.msra.mxu0 %v1383_v50  ;;  %v59_v50 = vld [vmem:[%s1639_s5 + $0x8] sm:$0x1] }
  0xf8   :  { %1202 = vmatprep.subr.bf16.mxu0 %v1384_v52  ;;  %1234 = vmatpush3.bf16.msra.mxu1 %v1398_v2  ;;  %v1017_v51 = vpack.c.bf16 %v59_v50, %v59_v50 }
  0xf9   :  { %1235 = vmatprep.subr.bf16.mxu1 %v1479_v3  ;;  %1249 = vmatprep.mubr.msk.bf16.mxu1 %vm1480_vm2, %v1479_v3 }
  0xfb   :  { %1203 = vmatpush3.bf16.msra.mxu0 %v1385_v53 }
  0xfc   :  { %1204 = vmatprep.subr.bf16.mxu0 %v1386_v54  ;;  %1236 = vmatpush3.bf16.msra.mxu1 %v1399_v4 }
  0xfd   :  { %1237 = vmatprep.subr.bf16.mxu1 %v1479_v3 }
  0xff   :  { %1205 = vmatpush3.bf16.msra.mxu0 %v1387_v55 }
 0x100   :  { %1206 = vmatprep.subr.bf16.mxu0 %v1388_v56  ;;  %1238 = vmatpush3.bf16.msra.mxu1 %v1400_v5 }
 0x101   :  { %1239 = vmatprep.subr.bf16.mxu1 %v1479_v3 }
 0x103   :  { %1207 = vmatpush3.bf16.msra.mxu0 %v1389_v57 }
 0x104   :  { %1208 = vmatprep.subr.bf16.mxu0 %v1390_v58  ;;  %1240 = vmatpush3.bf16.msra.mxu1 %v1401_v6 }
 0x105   :  { %1241 = vmatprep.subr.bf16.mxu1 %v1479_v3 }
 0x107   :  { %1209 = vmatpush3.bf16.msra.mxu0 %v1391_v59 }
 0x108   :  { %1210 = vmatprep.subr.bf16.mxu0 %v1392_v60  ;;  %1242 = vmatpush3.bf16.msra.mxu1 %v1402_v7 }
 0x109   :  { %1243 = vmatprep.subr.bf16.mxu1 %v1479_v3 }
 0x10b   :  { %1211 = vmatpush3.bf16.msra.mxu0 %v1393_v61 }
 0x10c   :  { %1212 = vmatprep.subr.bf16.mxu0 %v1394_v62  ;;  %1244 = vmatpush3.bf16.msra.mxu1 %v1403_v21 }
 0x10d   :  { %1245 = vmatprep.subr.bf16.mxu1 %v1479_v3 }
 0x10f   :  { %1213 = vmatpush3.bf16.msra.mxu0 %v1395_v63 }
 0x110   :  { %1214 = vmatprep.subr.bf16.mxu0 %v1396_v0  ;;  %1246 = vmatpush3.bf16.msra.mxu1 %v1404_v25 }
 0x111   :  { %1247 = vmatprep.subr.bf16.mxu1 %v1479_v3 }
 0x113   :  { %1215 = vmatpush3.bf16.msra.mxu0 %v1397_v1 }
 0x114   :  { %1253 = vmatprep.subr.bf16.mxu0 %v1479_v3  ;;  %1248 = vmatpush3.bf16.msra.mxu1 %v1405_v30 }
 0x16d   :  { %v1022_v52 = vpop.permute.xlu0 %1021 }
 0x16e   :  { %v1027_v53 = vrot.slane %v1022_v52, %v1532_v22 }
 0x1b6   :  { %v678_v11 = vpop.f32.mrf.mxu0 }
 0x1b7   :  { %v719_v12 = vpop.f32.mrf.mxu1  ;;  %v679_v13 = vadd.f32 %v678_v11, %v317_v9 }
 0x1b8   :  { %v680_v14 = vpop.f32.mrf.mxu0 }
 0x1b9   :  { %v721_v15 = vpop.f32.mrf.mxu1  ;;  %v720_v16 = vadd.f32 %v719_v12, %v679_v13  ;;  %v681_v17 = vadd.f32 %v680_v14, %v321_v10 }
 0x1ba   :  { %v682_v18 = vpop.f32.mrf.mxu0 }
 0x1bb   :  { %v723_v19 = vpop.f32.mrf.mxu1  ;;  %v722_v20 = vadd.f32 %v721_v15, %v681_v17  ;;  %v726_v23 = vmax.f32 %v720_v16, 0.0 }
 0x1bc   :  { %v683_v24 = vpop.f32.mrf.mxu0 }
 0x1bd   :  { %v724_v26 = vpop.f32.mrf.mxu1  ;;  %v727_v27 = vmax.f32 %v722_v20, 0.0  ;;  %v728_v29 = vpack.c.bf16 %v726_v23, %v726_v23 }
 0x1bf   :  { %v729_v28 = vpack.c.bf16 %v727_v27, %v727_v27 }
 0x1c1   :  { %896 = vmatprep.mubr.bf16.mxu0 %v729_v28 }
 0x1c2   :  { %897 = vmatmul.mubr.bf16.vlgmr.msra.gmra.mxu0 %v728_v29 }
 0x1c3   :  { %1255 = vmatprep.mubr.msk.bf16.mxu0 %vm1480_vm2, %v1479_v3 }
 0x282   :  { %v1216_v31 = vpop.f32.mrf.mxu0 }
 0x284   :  { %v1217_v33 = vpop.f32.mrf.mxu0 }
 0x285   :  { %v1218_v34 = vadd.f32 %v1217_v33, %v1216_v31 }
 0x286   :  { %v1219_v35 = vpop.f32.mrf.mxu0 }
 0x287   :  { %v899_v36 = vadd.f32 %v1218_v34, %v1173_v32 }
 0x288   :  { %v1220_v37 = vpop.f32.mrf.mxu0 }
 0x289   :  { %v904_v38 = vmax.f32 %v899_v36, 0.0 }
 0x28b   :  { %v905_v39 = vpack.c.bf16 %v904_v38, %v904_v38 }
 0x28d   :  { %1250 = vmatmul.mubr.bf16.vlgmr.msra.gmra.mxu1 %v905_v39 }
 0x34d   :  { %v1010_v42 = vpop.f32.mrf.mxu1 }
 0x34e   :  { %v1011_v43 = vadd.f32 %v1190_v41, %v1010_v42 }
 0x34f   :  { %v1251_v44 = vpop.f32.mrf.mxu1 }
 0x350   :  { %v1016_v45 = vmax.f32 %v1011_v43, 0.0 }
 0x351   :  { %v1013_v46 = vpop.f32.mrf.mxu1 }
 0x352   :  { %v1018_v47 = vpack.c.bf16 %v1016_v45, %v1016_v45 }
 0x353   :  { %v1252_v48 = vpop.f32.mrf.mxu1 }
 0x354   :  { %v1033_v49 = vsel %vm1028_vm3, %v1018_v47, 0 }
 0x355   :  { %1254 = vmatpush3.bf16.xpose.msra.mxu0 %v1033_v49 }
 0x35c   :  { %1256 = vmatmul.mubr.msk.bf16.vlgmr.msra.gmra.mxu0 %vm1028_vm3, %v1017_v51 }
 0x41c   :  { %v1069_v54 = vpop.f32.mrf.mxu0 }
 0x41d   :  { %v1070_v55 = vadd.f32 %v1069_v54, %v1027_v53 }
 0x41e   :  { %v1257_v56 = vpop.f32.mrf.mxu0 }
 0x41f   :  { %1076 = vst.msk [vmem:[#allocation7] sm:$0x1] %vm1075_vm4, %v1070_v55 }
 0x420   :  { %v1072_v57 = vpop.f32.mrf.mxu0 }
 0x421   :  { %1457 = shalt.err (!%p1454_p0)
}
 0x422   :  { %1086 = dma.vmem_to_hbm [thread:$0]  %s1084_s15, 16, %s1640_s6, [#allocation4]   ;;  %v1258_v22 = vpop.f32.mrf.mxu0 }
 0x423   :  { %1470 = dma.done.wait [#allocation4], 16  }
 0x424   :  { %1471 = vsyncadd [#allocation4], 4294967280 }
 0x425   :  { %1090 = vsyncpa [#allocation3], 1 }
 0x426   :  { %1091 = vsyncpa [#allocation6], 1 }
 0x427   :  { %1092 = vsyncpa [#allocation4], 1 }

</bundles_post_ra>
